<compile_context>
chip_gen: v5e
topology: v5e:2x2
jax: 0.10.0
libtpu: 0.0.40
codegen_flags: <defaults>
</compile_context>

<pallas_src>
import functools

import jax
import jax.numpy as jnp
from jax import lax
from jax.experimental import pallas as pl
from jax.experimental.pallas import tpu as pltpu

_LANE = 128
_SUBLANE = 8
_MAX_TILE_ROWS = 2048  # 2048 rows * 128 lanes * 4 B = 1 MiB per f32 input block


def _l1_partial_kernel(x_ref, t_ref, o_ref, *, rows, tr, kps):
    c = pl.program_id(0)  # core split axis ("parallel")
    k = pl.program_id(1)  # row-tile axis   ("arbitrary", accumulator axis)

    # Zero this split's (8, 128) accumulator at its first row tile.
    @pl.when(k == 0)
    def _():
        o_ref[...] = jnp.zeros_like(o_ref)

    row0 = (c * kps + k) * tr  # first global row covered by this block

    # Upcast in-register (inputs stay in their native dtype in HBM).
    xf = x_ref[...].astype(jnp.float32)
    tf = t_ref[...].astype(jnp.float32)
    a = jnp.abs(xf - tf)  # (tr, 128)

    is_full = row0 + tr <= rows

    # Hot path: full tile, no masking work; (tr,128)->(tr//8,8,128) is a
    # sublane-aligned (free) reshape, the axis-0 sum is pure VPU adds.
    @pl.when(is_full)
    def _():
        o_ref[...] += jnp.sum(a.reshape(tr // _SUBLANE, _SUBLANE, _LANE), axis=0)

    # Boundary tile: rows >= `rows` come from the partial DMA's unspecified
    # padding -> select them away.  A row-based mask IS the true flat-index
    # mask here because the slab is exactly 128 lanes wide and the sub-128
    # element tail is handled in the wrapper.
    @pl.when(jnp.logical_not(is_full))
    def _():
        local_row = lax.broadcasted_iota(jnp.int32, (tr, _LANE), 0)
        masked = jnp.where(row0 + local_row < rows, a, 0.0)
        o_ref[...] += jnp.sum(masked.reshape(tr // _SUBLANE, _SUBLANE, _LANE), axis=0)


def l1_loss(inp, target):
    assert inp.shape == target.shape, "input/target shapes must match"
    n = inp.size
    if n == 0:
        # torch.abs(x - y).mean() over an empty tensor is nan.
        return jnp.float32(jnp.nan)

    x = inp.reshape(-1)
    t = target.reshape(-1)

    n_main = (n // _LANE) * _LANE  # part handled by the kernel
    total = jnp.float32(0.0)

    if n_main > 0:
        rows = n_main // _LANE
        # No copy when n is a multiple of 128 (the common case); otherwise the
        # prefix slice is the only wrapper-side data movement.
        x_main = x if n_main == n else x[:n_main]
        t_main = t if n_main == n else t[:n_main]
        x2 = x_main.reshape(rows, _LANE)
        t2 = t_main.reshape(rows, _LANE)

        # Large row tile, always a multiple of 8; partial last tile is masked
        # inside the kernel (no divisor search, no physical padding).
        tr = min(_MAX_TILE_ROWS, pl.cdiv(rows, _SUBLANE) * _SUBLANE)
        nt = pl.cdiv(rows, tr)  # number of row tiles

        # Split the row tiles across a leading "parallel" axis so both
        # TensorCores participate on v7x (neutral on 1-TC v5e/v6e).
        nsplit = 2 if (nt >= 2 and nt % 2 == 0) else 1
        kps = nt // nsplit  # row tiles per split

        kernel = functools.partial(_l1_partial_kernel, rows=rows, tr=tr, kps=kps)
        in_map = lambda c, k: (c * kps + k, 0)

        partials = pl.pallas_call(
            kernel,
            out_shape=jax.ShapeDtypeStruct((nsplit, _SUBLANE, _LANE), jnp.float32),
            grid_spec=pltpu.PrefetchScalarGridSpec(
                num_scalar_prefetch=0,
                grid=(nsplit, kps),
                in_specs=[
                    pl.BlockSpec((tr, _LANE), in_map),
                    pl.BlockSpec((tr, _LANE), in_map),
                ],
                out_specs=pl.BlockSpec((None, _SUBLANE, _LANE), lambda c, k: (c, 0, 0)),
            ),
            compiler_params=pltpu.CompilerParams(
                dimension_semantics=("parallel", "arbitrary"),
            ),
        )(x2, t2)

        total = total + jnp.sum(partials)

    if n_main < n:
        # Sub-128-element flat tail: tiny jnp correction instead of padding
        # (and re-writing) the whole array.
        xt = x[n_main:].astype(jnp.float32)
        tt = t[n_main:].astype(jnp.float32)
        total = total + jnp.sum(jnp.abs(xt - tt))

    return total / jnp.float32(n)


if __name__ == "__main__":
    key = jax.random.PRNGKey(0)
    k1, k2 = jax.random.split(key)
    # Shapes consistent with a typical image-reconstruction loss input.
    x = jax.random.normal(k1, (2, 4, 16, 16), dtype=jnp.float32)
    y = jax.random.normal(k2, (2, 4, 16, 16), dtype=jnp.float32)

    loss = jax.block_until_ready(l1_loss(x, y))

    ref = jax.block_until_ready(jnp.mean(jnp.abs(x - y)))
    assert jnp.allclose(loss, ref, rtol=1e-5, atol=1e-6), (loss, ref)

    print("KERNEL_OK")
</pallas_src>

<mosaic_0001>
module attributes {stable_mosaic.version = 11 : i64} {
  func.func @_l1_partial_kernel(%arg0: i32, %arg1: i32, %arg2: memref<16x128xf32, #tpu.memory_space<vmem>>, %arg3: memref<16x128xf32, #tpu.memory_space<vmem>>, %arg4: memref<1x8x128xf32, #tpu.memory_space<vmem>>) attributes {dimension_semantics = [#tpu.dimension_semantics<parallel>, #tpu.dimension_semantics<arbitrary>], iteration_bounds = array<i64: 1, 1>, scalar_prefetch = 0 : i64, scratch_operands = 0 : i64, tpu.core_type = #tpu.core_type<tc>, window_params = [{transform_indices = @transform_0, window_bounds = array<i64: 16, 128>}, {transform_indices = @transform_1, window_bounds = array<i64: 16, 128>}, {transform_indices = @transform_2, window_bounds = array<i64: 1, 8, 128>}]} {
    %c0_i32 = arith.constant 0 : i32
    %0 = arith.cmpi eq, %arg1, %c0_i32 : i32
    %1 = arith.extui %0 : i1 to i32
    %c0_i32_0 = arith.constant 0 : i32
    %2 = arith.cmpi ne, %1, %c0_i32_0 : i32
    scf.if %2 {
      %cst = arith.constant 0.000000e+00 : f32
      %17 = vector.broadcast %cst : f32 to vector<8x128xf32>
      %c0_8 = arith.constant 0 : index
      %c0_9 = arith.constant 0 : index
      %c0_10 = arith.constant 0 : index
      %18 = vector.load %arg4[%c0_8, %c0_9, %c0_10] : memref<1x8x128xf32, #tpu.memory_space<vmem>>, vector<1x8x128xf32>
      %19 = vector.shape_cast %18 : vector<1x8x128xf32> to vector<8x128xf32>
      %20 = vector.shape_cast %17 : vector<8x128xf32> to vector<1x8x128xf32>
      tpu.vector_store %arg4[%c0_8, %c0_9, %c0_10], %20 {strides = array<i32>} : memref<1x8x128xf32, #tpu.memory_space<vmem>>, vector<1x8x128xf32>,
    } else {
    }
    %c1_i32 = arith.constant 1 : i32
    %3 = arith.muli %arg0, %c1_i32 : i32
    %4 = arith.addi %3, %arg1 : i32
    %c16_i32 = arith.constant 16 : i32
    %5 = arith.muli %4, %c16_i32 : i32
    %c0 = arith.constant 0 : index
    %c0_1 = arith.constant 0 : index
    %6 = vector.load %arg2[%c0, %c0_1] : memref<16x128xf32, #tpu.memory_space<vmem>>, vector<16x128xf32>
    %c0_2 = arith.constant 0 : index
    %c0_3 = arith.constant 0 : index
    %7 = vector.load %arg3[%c0_2, %c0_3] : memref<16x128xf32, #tpu.memory_space<vmem>>, vector<16x128xf32>
    %8 = arith.subf %6, %7 : vector<16x128xf32>
    %9 = math.absf %8 : vector<16x128xf32>
    %c16_i32_4 = arith.constant 16 : i32
    %10 = arith.addi %5, %c16_i32_4 : i32
    %c16_i32_5 = arith.constant 16 : i32
    %11 = arith.cmpi sle, %10, %c16_i32_5 : i32
    %12 = arith.extui %11 : i1 to i32
    %c0_i32_6 = arith.constant 0 : i32
    %13 = arith.cmpi ne, %12, %c0_i32_6 : i32
    scf.if %13 {
      %c0_8 = arith.constant 0 : index
      %c0_9 = arith.constant 0 : index
      %c0_10 = arith.constant 0 : index
      %17 = vector.load %arg4[%c0_8, %c0_9, %c0_10] : memref<1x8x128xf32, #tpu.memory_space<vmem>>, vector<1x8x128xf32>
      %18 = vector.shape_cast %17 : vector<1x8x128xf32> to vector<8x128xf32>
      %19 = vector.shape_cast %9 : vector<16x128xf32> to vector<2x8x128xf32>
      %cst = arith.constant dense<0.000000e+00> : vector<8x128xf32>
      %20 = vector.multi_reduction <add>, %19, %cst [0] : vector<2x8x128xf32> to vector<8x128xf32>
      %21 = arith.addf %18, %20 : vector<8x128xf32>
      %c0_11 = arith.constant 0 : index
      %c0_12 = arith.constant 0 : index
      %c0_13 = arith.constant 0 : index
      %22 = vector.load %arg4[%c0_11, %c0_12, %c0_13] : memref<1x8x128xf32, #tpu.memory_space<vmem>>, vector<1x8x128xf32>
      %23 = vector.shape_cast %22 : vector<1x8x128xf32> to vector<8x128xf32>
      %24 = vector.shape_cast %21 : vector<8x128xf32> to vector<1x8x128xf32>
      tpu.vector_store %arg4[%c0_11, %c0_12, %c0_13], %24 {strides = array<i32>} : memref<1x8x128xf32, #tpu.memory_space<vmem>>, vector<1x8x128xf32>,
    } else {
    }
    %true = arith.constant true
    %14 = arith.xori %11, %true : i1
    %15 = arith.extui %14 : i1 to i32
    %c0_i32_7 = arith.constant 0 : i32
    %16 = arith.cmpi ne, %15, %c0_i32_7 : i32
    scf.if %16 {
      %17 = tpu.iota {dimensions = array<i32: 0>} : vector<16x128xi32>
      %18 = vector.broadcast %5 : i32 to vector<16x128xi32>
      %19 = arith.addi %18, %17 : vector<16x128xi32>
      %c16_i32_8 = arith.constant 16 : i32
      %20 = vector.broadcast %c16_i32_8 : i32 to vector<16x128xi32>
      %21 = arith.cmpi slt, %19, %20 : vector<16x128xi32>
      %cst = arith.constant 0.000000e+00 : f32
      %22 = vector.broadcast %cst : f32 to vector<16x128xf32>
      %23 = arith.select %21, %9, %22 : vector<16x128xi1>, vector<16x128xf32>
      %c0_9 = arith.constant 0 : index
      %c0_10 = arith.constant 0 : index
      %c0_11 = arith.constant 0 : index
      %24 = vector.load %arg4[%c0_9, %c0_10, %c0_11] : memref<1x8x128xf32, #tpu.memory_space<vmem>>, vector<1x8x128xf32>
      %25 = vector.shape_cast %24 : vector<1x8x128xf32> to vector<8x128xf32>
      %26 = vector.shape_cast %23 : vector<16x128xf32> to vector<2x8x128xf32>
      %cst_12 = arith.constant dense<0.000000e+00> : vector<8x128xf32>
      %27 = vector.multi_reduction <add>, %26, %cst_12 [0] : vector<2x8x128xf32> to vector<8x128xf32>
      %28 = arith.addf %25, %27 : vector<8x128xf32>
      %c0_13 = arith.constant 0 : index
      %c0_14 = arith.constant 0 : index
      %c0_15 = arith.constant 0 : index
      %29 = vector.load %arg4[%c0_13, %c0_14, %c0_15] : memref<1x8x128xf32, #tpu.memory_space<vmem>>, vector<1x8x128xf32>
      %30 = vector.shape_cast %29 : vector<1x8x128xf32> to vector<8x128xf32>
      %31 = vector.shape_cast %28 : vector<8x128xf32> to vector<1x8x128xf32>
      tpu.vector_store %arg4[%c0_13, %c0_14, %c0_15], %31 {strides = array<i32>} : memref<1x8x128xf32, #tpu.memory_space<vmem>>, vector<1x8x128xf32>,
    } else {
    }
    return
  }
  func.func @transform_0(%arg0: i32, %arg1: i32) -> (i32, i32) {
    %c1_i32 = arith.constant 1 : i32
    %0 = arith.muli %arg0, %c1_i32 : i32
    %1 = arith.addi %0, %arg1 : i32
    %c0_i32 = arith.constant 0 : i32
    %c0_i32_0 = arith.constant 0 : i32
    return %1, %c0_i32 : i32, i32
  }
  func.func @transform_1(%arg0: i32, %arg1: i32) -> (i32, i32) {
    %c1_i32 = arith.constant 1 : i32
    %0 = arith.muli %arg0, %c1_i32 : i32
    %1 = arith.addi %0, %arg1 : i32
    %c0_i32 = arith.constant 0 : i32
    %c0_i32_0 = arith.constant 0 : i32
    return %1, %c0_i32 : i32, i32
  }
  func.func @transform_2(%arg0: i32, %arg1: i32) -> (i32, i32, i32) {
    %c0_i32 = arith.constant 0 : i32
    %c0_i32_0 = arith.constant 0 : i32
    %c0_i32_1 = arith.constant 0 : i32
    return %arg0, %c0_i32, %c0_i32_0 : i32, i32, i32
  }
}

</mosaic_0001>

<bundles_post_ra>
// kernel: tpu_custom_call.1
= control target key start
LH: loop header
LB: loop body
LE: loop exit
PB: predicated region body
PF: predicated region fallthrough
CT: control target
= control target key end

     0   :  { %7 = vsyncpa [#allocation3], 0  ;;  %s229_s0 = inlined_call_operand.hbm [shape: f32[16,128], index: 0, kind: input, shape index: {}]   ;;  %s230_s1 = inlined_call_operand.hbm [shape: f32[16,128], index: 1, kind: input, shape index: {}]   ;;  %s231_s2 = inlined_call_operand.hbm [shape: f32[1,8,128], index: 2, kind: output, shape index: {}]  }
   0x1   :  { %8 = vsyncpa [#allocation6], 0 }
   0x2   :  { %9 = vsyncpa [#allocation4], 0  ;;  %s18_s11 = sshll.u32 %s229_s0, 4  ;;  %s200_s12 = smov [#allocation2]   ;;  %s19_s11 = int_to_ptr.hbm [resolvable:$true] %s18_s11 }
   0x3   :  { %s20_s13 = sshll.u32 %s200_s12, 4  ;;  %s35_s16 = sshll.u32 %s230_s1, 4  ;;  %s21_s13 = int_to_ptr.vmem [resolvable:$true] %s20_s13  ;;  %s36_s16 = int_to_ptr.hbm [resolvable:$true] %s35_s16 }
   0x4   :  { %s201_s17 = smov 128   ;;  %s202_s18 = smov 8  }
   0x5   :  { %26 = dma.hbm_to_vmem [thread:$0]  %s19_s11, 256, %s21_s13, [#allocation3], %s201_s17, %s201_s17, %s202_s18  }
   0x6   :  { %s203_s19 = smov [#allocation5]  }
   0x7   :  { %s37_s20 = sshll.u32 %s203_s19, 4  ;;  %s38_s20 = int_to_ptr.vmem [resolvable:$true] %s37_s20 }
   0x8   :  { %43 = dma.hbm_to_vmem [thread:$0]  %s36_s16, 256, %s38_s20, [#allocation6], %s201_s17, %s201_s17, %s202_s18  }
   0x9   :  { %194 = dma.done.wait [#allocation3], 256  }
   0xa   :  { %195 = vsyncadd [#allocation3], 4294967040 }
   0xb   :  { %196 = dma.done.wait [#allocation6], 256  }
   0xc   :  { %197 = vsyncadd [#allocation6], 4294967040  ;;  %v63_v0 = vld [vmem:[#allocation2] sm:$0xff]  ;;  %v64_v1 = vld [vmem:[#allocation2 + $0x8] sm:$0xff]  ;;  %s204_s0 = smov [#allocation7]   ;;  %s105_s23 = sshll.u32 %s231_s2, 4  ;;  %s106_s23 = int_to_ptr.hbm [resolvable:$true] %s105_s23 }
   0xd   :  { %v65_v2 = vld [vmem:[#allocation5] sm:$0xff]  ;;  %v66_v3 = vld [vmem:[#allocation5 + $0x8] sm:$0xff]  ;;  %s103_s1 = sshll.u32 %s204_s0, 4  ;;  %s104_s1 = int_to_ptr.vmem [resolvable:$true] %s103_s1 }
   0xe   :  { %v67_v4 = vsub.f32 %v63_v0, %v65_v2  ;;  %v68_v5 = vsub.f32 %v64_v1, %v66_v3 }
  0x10   :  { %v69_v6 = vand.u32 2147483647, %v67_v4  ;;  %v70_v7 = vand.u32 2147483647, %v68_v5 }
  0x12   :  { %v77_v8 = vadd.f32 %v70_v7, %v69_v6 }
  0x14   :  { %79 = vst [vmem:[#allocation7] sm:$0xff] %v77_v8 }
  0x15   :  { %108 = dma.vmem_to_hbm [thread:$0]  %s104_s1, 128, %s106_s23, [#allocation4]  }
  0x16   :  { %198 = dma.done.wait [#allocation4], 128  }
  0x17   :  { %199 = vsyncadd [#allocation4], 4294967168 }
  0x18   :  { %113 = vsyncpa [#allocation3], 1 }
  0x19   :  { %114 = vsyncpa [#allocation6], 1 }
  0x1a   :  { %115 = vsyncpa [#allocation4], 1 }

</bundles_post_ra>
